<compile_context>
chip_gen: v5e
topology: v5e:2x2
jax: 0.10.0
libtpu: 0.0.40
codegen_flags: <defaults>
</compile_context>

<pallas_src>
import functools
import math

import jax
import jax.numpy as jnp
from jax.experimental import pallas as pl
from jax.experimental.pallas import tpu as pltpu


def _ffn_kernel(x_ref, w1_ref, b1_ref, w2_ref, b2_ref, o_ref, acc_ref):
    # x_ref:  (tile_m, D)   native dtype (bf16/f32) -> MXU operand
    # w1_ref: (D, tile_h)   native dtype
    # b1_ref: (1, tile_h)
    # w2_ref: (tile_h, D)   native dtype
    # b2_ref: (1, D)
    # o_ref:  (tile_m, D)
    # acc_ref:(tile_m, D)   f32 accumulator over the hidden (H) reduction axis
    h_step = pl.program_id(1)

    @pl.when(h_step == 0)
    def _():
        acc_ref[...] = jnp.zeros_like(acc_ref)

    # First linear (partial over this H tile). Keep MXU operands in native dtype,
    # accumulate in f32 via preferred_element_type.
    hid = jnp.dot(x_ref[...], w1_ref[...], preferred_element_type=jnp.float32)
    hid = hid + b1_ref[...].astype(jnp.float32)

    # Exact (erf-based) GELU in f32, matching torch.nn.GELU() default.
    hid = 0.5 * hid * (1.0 + jax.lax.erf(hid * jnp.float32(0.7071067811865476)))

    # TODO(synk): Dropout is identity in eval mode; training-mode dropout
    # (pltpu.prng_seed / prng_random_bits) is intentionally not emitted.

    # Second linear: cast the activation back to the weight dtype so the MXU stays on
    # its native (e.g. bf16) input path; accumulate partial products in f32.
    acc_ref[...] += jnp.dot(hid.astype(w2_ref.dtype), w2_ref[...],
                            preferred_element_type=jnp.float32)

    @pl.when(h_step == pl.num_programs(1) - 1)
    def _():
        o_ref[...] = (acc_ref[...] + b2_ref[...].astype(jnp.float32)).astype(o_ref.dtype)


def _choose_tile(total, preferred, granularity):
    """Largest tile <= preferred that divides `total` and is a multiple of
    `granularity`; falls back to the full extent."""
    if total <= preferred:
        return total
    t = (min(preferred, total) // granularity) * granularity
    while t >= granularity:
        if total % t == 0:
            return t
        t -= granularity
    return total


@functools.partial(jax.jit, static_argnames=("tile_m", "tile_h"))
def feed_forward(x, w1, b1, w2, b2, tile_m=None, tile_h=None):
    """x: [B, S, D]; w1: [D, H]; b1: [H]; w2: [H, D]; b2: [D] -> [B, S, D]."""
    B, S, D = x.shape
    H = w1.shape[1]
    M = B * S
    x2 = x.reshape(M, D)

    if tile_m is None:
        # 256-granular preferred (fills the 256x256 MXU on v6e/v7x; multiple of 128 for v5e).
        tile_m = _choose_tile(M, 256, 8)
        # Prefer >=2 M steps so the 'parallel' axis can shard across v7x's 2 TensorCores
        # and the x-tile pipeline actually double-buffers.
        if tile_m == M and M >= 16 and (M // 2) % 8 == 0:
            tile_m = M // 2
    if tile_h is None:
        tile_h = _choose_tile(H, 2048, 128)

    assert M % tile_m == 0 and (tile_m % 8 == 0 or tile_m == M), (M, tile_m)
    assert H % tile_h == 0 and (tile_h % 128 == 0 or tile_h == H), (H, tile_h)

    grid = (M // tile_m, H // tile_h)

    # Rough per-step VMEM footprint (double-buffered ins/outs + f32 accumulator).
    itemsize = jnp.dtype(x.dtype).itemsize
    est_vmem = (2 * itemsize * (tile_m * D + D * tile_h + tile_h + tile_h * D + D + tile_m * D)
                + 4 * tile_m * D)
    vmem_limit = int(min(128 * 1024 * 1024, max(32 * 1024 * 1024, 2 * est_vmem)))

    cost = pl.CostEstimate(
        flops=4 * M * D * H,
        transcendentals=M * H,
        bytes_accessed=itemsize * (2 * M * D + D * H + H + H * D + D),
    )

    out = pl.pallas_call(
        _ffn_kernel,
        out_shape=jax.ShapeDtypeStruct((M, D), x.dtype),
        grid_spec=pltpu.PrefetchScalarGridSpec(
            num_scalar_prefetch=0,
            grid=grid,
            in_specs=[
                pl.BlockSpec((tile_m, D), lambda i, h: (i, 0)),   # x token tile
                pl.BlockSpec((D, tile_h), lambda i, h: (0, h)),   # W1 hidden tile
                pl.BlockSpec((1, tile_h), lambda i, h: (0, h)),   # b1 hidden tile
                pl.BlockSpec((tile_h, D), lambda i, h: (h, 0)),   # W2 hidden tile
                pl.BlockSpec((1, D), lambda i, h: (0, 0)),        # b2 (constant)
            ],
            out_specs=pl.BlockSpec((tile_m, D), lambda i, h: (i, 0)),
            scratch_shapes=[pltpu.VMEM((tile_m, D), jnp.float32)],
        ),
        compiler_params=pltpu.CompilerParams(
            dimension_semantics=("parallel", "arbitrary"),
            vmem_limit_bytes=vmem_limit,
        ),
        cost_estimate=cost,
    )(x2, w1, b1.reshape(1, H), w2, b2.reshape(1, D))

    return out.reshape(B, S, D)


def init_params(key, dim, hidden_dim, dtype=jnp.float32):
    """Deterministic init mimicking nn.Linear's uniform(-1/sqrt(fan_in), 1/sqrt(fan_in))."""
    k1, k2, k3, k4 = jax.random.split(key, 4)
    lim1 = 1.0 / math.sqrt(dim)
    lim2 = 1.0 / math.sqrt(hidden_dim)
    w1 = jax.random.uniform(k1, (dim, hidden_dim), dtype, -lim1, lim1)   # [in, out]
    b1 = jax.random.uniform(k2, (hidden_dim,), dtype, -lim1, lim1)
    w2 = jax.random.uniform(k3, (hidden_dim, dim), dtype, -lim2, lim2)   # [in, out]
    b2 = jax.random.uniform(k4, (dim,), dtype, -lim2, lim2)
    return w1, b1, w2, b2


if __name__ == "__main__":
    # Small shapes, but chosen so the toy run exercises both grid axes
    # (2 parallel M steps x 2 arbitrary H steps with f32 accumulation) and
    # keeps the output lane dim a full multiple of 128.
    B, S, D, H = 2, 32, 128, 256
    key = jax.random.PRNGKey(0)
    kx, kp = jax.random.split(key)

    x = jax.random.normal(kx, (B, S, D), dtype=jnp.float32)
    w1, b1, w2, b2 = init_params(kp, D, H)

    out = feed_forward(x, w1, b1, w2, b2, tile_m=32, tile_h=128)
    out = jax.block_until_ready(out)

    # Reference check in plain JAX (exact-erf GELU, dropout inert in eval).
    ref = jnp.einsum("bsd,dh->bsh", x, w1) + b1
    ref = jax.nn.gelu(ref, approximate=False)
    ref = jnp.einsum("bsh,hd->bsd", ref, w2) + b2

    assert out.shape == (B, S, D)
    assert jnp.allclose(out, ref, atol=1e-4, rtol=1e-4), "mismatch vs reference"

    print("KERNEL_OK")
</pallas_src>

<mosaic_0001>
module attributes {stable_mosaic.version = 11 : i64} {
  func.func @_ffn_kernel(%arg0: i32, %arg1: i32, %arg2: memref<32x128xf32, #tpu.memory_space<vmem>>, %arg3: memref<128x128xf32, #tpu.memory_space<vmem>>, %arg4: memref<1x128xf32, #tpu.memory_space<vmem>>, %arg5: memref<128x128xf32, #tpu.memory_space<vmem>>, %arg6: memref<1x128xf32, #tpu.memory_space<vmem>>, %arg7: memref<32x128xf32, #tpu.memory_space<vmem>>, %arg8: memref<32x128xf32, #tpu.memory_space<vmem>>) attributes {dimension_semantics = [#tpu.dimension_semantics<parallel>, #tpu.dimension_semantics<arbitrary>], iteration_bounds = array<i64: 2, 2>, scalar_prefetch = 0 : i64, scratch_operands = 1 : i64, tpu.core_type = #tpu.core_type<tc>, window_params = [{transform_indices = @transform_0, window_bounds = array<i64: 32, 128>}, {transform_indices = @transform_1, window_bounds = array<i64: 128, 128>}, {transform_indices = @transform_2, window_bounds = array<i64: 1, 128>}, {transform_indices = @transform_3, window_bounds = array<i64: 128, 128>}, {pipeline_mode = #tpu.pipeline_mode<synchronous>, transform_indices = @transform_4, window_bounds = array<i64: 1, 128>}, {transform_indices = @transform_5, window_bounds = array<i64: 32, 128>}]} {
    %c0_i32 = arith.constant 0 : i32
    %0 = arith.cmpi eq, %arg1, %c0_i32 : i32
    %1 = arith.extui %0 : i1 to i32
    %c0_i32_0 = arith.constant 0 : i32
    %2 = arith.cmpi ne, %1, %c0_i32_0 : i32
    scf.if %2 {
      %cst_17 = arith.constant 0.000000e+00 : f32
      %25 = vector.broadcast %cst_17 : f32 to vector<32x128xf32>
      %c0_18 = arith.constant 0 : index
      %c0_19 = arith.constant 0 : index
      %26 = vector.load %arg8[%c0_18, %c0_19] : memref<32x128xf32, #tpu.memory_space<vmem>>, vector<32x128xf32>
      tpu.vector_store %arg8[%c0_18, %c0_19], %25 {strides = array<i32>} : memref<32x128xf32, #tpu.memory_space<vmem>>, vector<32x128xf32>,
    } else {
    }
    %c0 = arith.constant 0 : index
    %c0_1 = arith.constant 0 : index
    %3 = vector.load %arg2[%c0, %c0_1] : memref<32x128xf32, #tpu.memory_space<vmem>>, vector<32x128xf32>
    %c0_2 = arith.constant 0 : index
    %c0_3 = arith.constant 0 : index
    %4 = vector.load %arg3[%c0_2, %c0_3] : memref<128x128xf32, #tpu.memory_space<vmem>>, vector<128x128xf32>
    %cst = arith.constant dense<0.000000e+00> : vector<32x128xf32>
    %5 = tpu.matmul %3, %4, %cst {dimension_numbers = #tpu.dot_dimension_numbers<[1], [0], [0], [1], [0, 0, 1, 1], [], []>} : vector<32x128xf32>, vector<128x128xf32>, vector<32x128xf32> -> vector<32x128xf32>
    %c0_4 = arith.constant 0 : index
    %c0_5 = arith.constant 0 : index
    %6 = vector.load %arg4[%c0_4, %c0_5] : memref<1x128xf32, #tpu.memory_space<vmem>>, vector<1x128xf32>
    %7 = vector.broadcast %6 : vector<1x128xf32> to vector<32x128xf32>
    %8 = arith.addf %5, %7 : vector<32x128xf32>
    %cst_6 = arith.constant 5.000000e-01 : f32
    %9 = vector.broadcast %cst_6 : f32 to vector<32x128xf32>
    %10 = arith.mulf %9, %8 : vector<32x128xf32>
    %cst_7 = arith.constant 0.707106769 : f32
    %11 = vector.broadcast %cst_7 : f32 to vector<32x128xf32>
    %12 = arith.mulf %8, %11 : vector<32x128xf32>
    %13 = math.erf %12 : vector<32x128xf32>
    %cst_8 = arith.constant 1.000000e+00 : f32
    %14 = vector.broadcast %cst_8 : f32 to vector<32x128xf32>
    %15 = arith.addf %14, %13 : vector<32x128xf32>
    %16 = arith.mulf %10, %15 : vector<32x128xf32>
    %c0_9 = arith.constant 0 : index
    %c0_10 = arith.constant 0 : index
    %17 = vector.load %arg8[%c0_9, %c0_10] : memref<32x128xf32, #tpu.memory_space<vmem>>, vector<32x128xf32>
    %c0_11 = arith.constant 0 : index
    %c0_12 = arith.constant 0 : index
    %18 = vector.load %arg5[%c0_11, %c0_12] : memref<128x128xf32, #tpu.memory_space<vmem>>, vector<128x128xf32>
    %cst_13 = arith.constant dense<0.000000e+00> : vector<32x128xf32>
    %19 = tpu.matmul %16, %18, %cst_13 {dimension_numbers = #tpu.dot_dimension_numbers<[1], [0], [0], [1], [0, 0, 1, 1], [], []>} : vector<32x128xf32>, vector<128x128xf32>, vector<32x128xf32> -> vector<32x128xf32>
    %20 = arith.addf %17, %19 : vector<32x128xf32>
    %c0_14 = arith.constant 0 : index
    %c0_15 = arith.constant 0 : index
    %21 = vector.load %arg8[%c0_14, %c0_15] : memref<32x128xf32, #tpu.memory_space<vmem>>, vector<32x128xf32>
    tpu.vector_store %arg8[%c0_14, %c0_15], %20 {strides = array<i32>} : memref<32x128xf32, #tpu.memory_space<vmem>>, vector<32x128xf32>,
    %c1_i32 = arith.constant 1 : i32
    %22 = arith.cmpi eq, %arg1, %c1_i32 : i32
    %23 = arith.extui %22 : i1 to i32
    %c0_i32_16 = arith.constant 0 : i32
    %24 = arith.cmpi ne, %23, %c0_i32_16 : i32
    scf.if %24 {
      %c0_17 = arith.constant 0 : index
      %c0_18 = arith.constant 0 : index
      %25 = vector.load %arg8[%c0_17, %c0_18] : memref<32x128xf32, #tpu.memory_space<vmem>>, vector<32x128xf32>
      %c0_19 = arith.constant 0 : index
      %c0_20 = arith.constant 0 : index
      %26 = vector.load %arg6[%c0_19, %c0_20] : memref<1x128xf32, #tpu.memory_space<vmem>>, vector<1x128xf32>
      %27 = vector.broadcast %26 : vector<1x128xf32> to vector<32x128xf32>
      %28 = arith.addf %25, %27 : vector<32x128xf32>
      %c0_21 = arith.constant 0 : index
      %c0_22 = arith.constant 0 : index
      %29 = vector.load %arg7[%c0_21, %c0_22] : memref<32x128xf32, #tpu.memory_space<vmem>>, vector<32x128xf32>
      tpu.vector_store %arg7[%c0_21, %c0_22], %28 {strides = array<i32>} : memref<32x128xf32, #tpu.memory_space<vmem>>, vector<32x128xf32>,
    } else {
    }
    return
  }
  func.func @transform_0(%arg0: i32, %arg1: i32) -> (i32, i32) {
    %c0_i32 = arith.constant 0 : i32
    %c0_i32_0 = arith.constant 0 : i32
    return %arg0, %c0_i32 : i32, i32
  }
  func.func @transform_1(%arg0: i32, %arg1: i32) -> (i32, i32) {
    %c0_i32 = arith.constant 0 : i32
    %c0_i32_0 = arith.constant 0 : i32
    return %c0_i32, %arg1 : i32, i32
  }
  func.func @transform_2(%arg0: i32, %arg1: i32) -> (i32, i32) {
    %c0_i32 = arith.constant 0 : i32
    %c0_i32_0 = arith.constant 0 : i32
    return %c0_i32, %arg1 : i32, i32
  }
  func.func @transform_3(%arg0: i32, %arg1: i32) -> (i32, i32) {
    %c0_i32 = arith.constant 0 : i32
    %c0_i32_0 = arith.constant 0 : i32
    return %arg1, %c0_i32 : i32, i32
  }
  func.func @transform_4(%arg0: i32, %arg1: i32) -> (i32, i32) {
    %c0_i32 = arith.constant 0 : i32
    %c0_i32_0 = arith.constant 0 : i32
    %c0_i32_1 = arith.constant 0 : i32
    return %c0_i32, %c0_i32_0 : i32, i32
  }
  func.func @transform_5(%arg0: i32, %arg1: i32) -> (i32, i32) {
    %c0_i32 = arith.constant 0 : i32
    %c0_i32_0 = arith.constant 0 : i32
    return %arg0, %c0_i32 : i32, i32
  }
}

</mosaic_0001>

<bundles_post_ra>
// kernel: feed_forward.1
= control target key start
LH: loop header
LB: loop body
LE: loop exit
PB: predicated region body
PF: predicated region fallthrough
CT: control target
= control target key end

     0   :  { %s1680_s0 = inlined_call_operand.hbm [shape: f32[64,128], index: 0, kind: input, shape index: {}]   ;;  %s1681_s1 = inlined_call_operand.hbm [shape: f32[128,256], index: 1, kind: input, shape index: {}]   ;;  %s1682_s2 = inlined_call_operand.vmem [shape: f32[1,256], index: 2, kind: input, shape index: {}]   ;;  %s1683_s3 = inlined_call_operand.hbm [shape: f32[256,128], index: 3, kind: input, shape index: {}]   ;;  %s1684_s4 = inlined_call_operand.vmem [shape: f32[1,128], index: 4, kind: input, shape index: {}]   ;;  %s1685_s5 = inlined_call_operand.hbm [shape: f32[64,128], index: 5, kind: output, shape index: {}]  }
   0x1   :  { %1700 = sst [smem:[#allocation24_spill]] %s1681_s1 }
   0x2   :  { %1701 = sst [smem:[#allocation25_spill]] %s1682_s2 }
   0x3   :  { %1702 = sst [smem:[#allocation26_spill]] %s1684_s4 }
   0x4   :  { %1703 = sst [smem:[#allocation27_spill]] %s1685_s5 }
   0x5   :  { %10 = vsyncpa [#allocation4], 0 }
   0x6   :  { %12 = vsyncpa [#allocation4 + $0x1], 0 }
   0x7   :  { %13 = vsyncpa [#allocation7], 0 }
   0x8   :  { %15 = vsyncpa [#allocation7 + $0x1], 0 }
   0x9   :  { %16 = vsyncpa [#allocation5], 0 }
   0xa   :  { %18 = vsyncpa [#allocation5 + $0x1], 0  ;;  %s1265_s18 = smov 0   ;;  %s1267_s19 = smov 0  }
   0xb   :  { %s1269_s20 = smov 0   ;;  %s1271_s21 = smov 0  }
   0xc   :  { %s1273_s22 = smov 0   ;;  %s1275_s23 = smov 0  }
   0xd   :  { %s1277_s24 = smov 0   ;;  %s1279_s25 = smov 0  }
   0xe   :  { %s1281_s26 = smov 0   ;;  %s1283_s27 = smov 0  }
   0xf   :  { %s1285_s28 = smov 0  }
  0x10 LB: > { %1704 = sst [smem:[#allocation13_spill]] %s1195_s20  ;;  %s33_s29 = sadd.s32 1, %s1219_s26  ;;  %s1227_s28 = sphi %s1285_s28, %s24_s28   ;;  %s1223_s27 = sphi %s1283_s27, %s1741_s27   ;;  %s1219_s26 = sphi %s1281_s26, %s1747_s26   ;;  %s1215_s25 = sphi %s1279_s25, %s1739_s25   ;;  %s1211_s24 = sphi %s1277_s24, %s1746_s24   ;;  %s1207_s23 = sphi %s1275_s23, %s1738_s23   ;;  %s1203_s22 = sphi %s1273_s22, %s1745_s22   ;;  %s1199_s21 = sphi %s1271_s21, %s1744_s21   ;;  %s1195_s20 = sphi %s1269_s20, %s1736_s20   ;;  %s1191_s19 = sphi %s1267_s19, %s1743_s19   ;;  %s1187_s18 = sphi %s1265_s18, %s1742_s18  }
  0x11   : > { %1705 = sst [smem:[#allocation14_spill]] %s1199_s21  ;;  %p51_p0 = scmp.eq.s32.totalorder %s1227_s28, 0 }
  0x12   : > { %1706 = sst [smem:[#allocation15_spill]] %s1207_s23  ;;  %p1322_p1 = scmp.ge.s32.totalorder %s33_s29, 2 }
  0x13   : > { %1707 = sst [smem:[#allocation16_spill]] %s1215_s25  ;;  %s69_s6 = sadd.s32 1, %s1195_s20 }
  0x14   : > { %1708 = sst [smem:[#allocation17_spill]] %s1223_s27  ;;  %p76_p2 = scmp.ne.s32.totalorder %s1195_s20, %s1191_s19 }
  0x15   : > { %p82_p3 = scmp.ne.s32.totalorder %s1191_s19, %s1187_s18  ;;  %s1749_s29 = smov (%p1322_p1, %s33_s29), 0 }
  0x16   : > { %1710 = sst [smem:[#allocation18_spill]] %s1749_s29  ;;  %p1337_p4 = por %p76_p2, %p51_p0 }
  0x17   : > { %s66_s8 = ssub.s32 %s1219_s26, %s1749_s29  ;;  %p905_p5 = scmp.lt.s32.totalorder %s1227_s28, 4 }
  0x18   : > { %p67_p6 = scmp.eq.s32.totalorder %s66_s8, 0  ;;  %s230_s9 = sand.u32 1, %s1227_s28  }
  0x19   : > { %s232_s11 = sand.u32 1, %s1195_s20   ;;  %s828_s13 = sshll.u32 %s1219_s26, 3 }
  0x1a   : > { %s1346_s10 = scalar_select %p67_p6, %s1195_s20, %s69_s6  }
  0x1b   : > { %s1349_s12 = sshll.u32 %s232_s11, 7  ;;  %s1713_s1 = sld [smem:[#allocation24_spill]] }
  0x1c   : > { %1712 = sst [smem:[#allocation19_spill]] %s1346_s10  ;;  %s234_s29 = scalar_lea.vmem [#allocation6], %s1349_s12 }
  0x1d   : > { %s241_s5 = sshll.u32 %s234_s29, 4  ;;  %p1360_p7 = pnand %p905_p5, %p1337_p4  ;;  %s242_s5 = int_to_ptr.vmem [resolvable:$true] %s241_s5 }
  0x1e   : > { %p832_p8 = scmp.ge.s32.totalorder %s1227_s28, 1  ;;  %p277_p9 = scmp.lt.s32.totalorder %s1227_s28, 5 }
  0x1f   : > { %s1366_s8 = scalar_lea.sflag [#allocation7], %s230_s9  ;;  %s1229_s29 = smov 256  }
  0x20   : > { %s1688_s11 = smov 128   ;;  %p1373_p10 = pnand %p832_p8, %p277_p9 }
  0x21   : > { %s238_s16 = scalar_lea.hbm %s1713_s1, %s828_s13  ;;  %s1690_s13 = smov 8  }
  0x22   : > { %s239_s17 = sshll.u32 %s238_s16, 4  ;;  %s1378_s14 = sadd.s32 4294967295, %s1227_s28   ;;  %s240_s17 = int_to_ptr.hbm [resolvable:$true] %s239_s17 }
  0x23   : > { %897 = dma.hbm_to_vmem [thread:$0]  (!%p1360_p7), %s240_s17, 2048, %s242_s5, %s1366_s8, %s1229_s29, %s1688_s11, %s1690_s13  }
  0x24   : > { %s821_s9 = sadd.s32 4294967294, %s1227_s28   ;;  %s36_s15 = sadd.s32 1, %s1223_s27 }
  0x25   : > { %s43_s16 = sadd.s32 1, %s1207_s23  ;;  %s1751_s15 = smov (!%p1322_p1, %s36_s15), %s1223_s27 }
  0x26   : > { %p50_p11 = scmp.ne.s32.totalorder %s1207_s23, %s1203_s22  ;;  %p56_p12 = scmp.ne.s32.totalorder %s1203_s22, %s1199_s21 }
  0x27   : > { %p38_p13 = scmp.ge.s32.totalorder %s1751_s15, 2  ;;  %p57_p2 = scmp.eq.s32.totalorder %s1378_s14, 0 }
  0x28   : > { %p1393_p4 = por %p51_p0, %p50_p11  ;;  %p179_p6 = scmp.eq.s32.totalorder %s1378_s14, 3 }
  0x29   : > { %s1753_s15 = smov (%p38_p13, %s1751_s15), 0  ;;  %p1403_p8 = por %p57_p2, %p56_p12 }
  0x2a   : > { %1717 = sst [smem:[#allocation20_spill]] %s1753_s15  ;;  %p1410_p1 = por %p82_p3, %p57_p2 }
  0x2b   : > { %s40_s29 = ssub.s32 %s1223_s27, %s1753_s15  ;;  %p1416_p0 = por %p179_p6, %p50_p11 }
  0x2c   : > { %p41_p9 = scmp.eq.s32.totalorder %s40_s29, 0  ;;  %p185_p13 = scmp.eq.s32.totalorder %s821_s9, 3 }
  0x2d   : > { %s1720_s11 = scalar_select %p1416_p0, 1, 0 }
  0x2e   : > { %s208_s13 = sand.u32 1, %s1207_s23   ;;  %s848_s1 = sshll.u32 %s1223_s27, 5 }
  0x2f   : > { %1721 = sst [smem:[#allocation21_spill]] %s1720_s11  ;;  %p1428_p3 = por %p185_p13, %p56_p12 }
  0x30   : > { %s1423_s10 = scalar_select %p41_p9, %s1207_s23, %s43_s16  }
  0x31   : > { %s1723_s18 = scalar_select %p1428_p3, 1, 0 }
  0x32   : > { %1722 = sst [smem:[#allocation22_spill]] %s1423_s10  ;;  %s824_s20 = sshll.u32 %s208_s13, 5 }
  0x33   : > { %1724 = sst [smem:[#allocation23_spill]] %s1723_s18  ;;  %s217_s4 = scalar_lea.hbm %s1680_s0, %s848_s1 }
  0x34   : > { %s218_s11 = sshll.u32 %s217_s4, 4  ;;  %s212_s9 = scalar_lea.vmem [#allocation3], %s824_s20  ;;  %s219_s11 = int_to_ptr.hbm [resolvable:$true] %s218_s11 }
  0x35   : > { %s220_s29 = sshll.u32 %s212_s9, 4  ;;  %p892_p11 = pnand %p905_p5, %p1393_p4  ;;  %s221_s29 = int_to_ptr.vmem [resolvable:$true] %s220_s29 }
  0x36   : > { %s849_s16 = sshll.u32 %s1219_s26, 7  ;;  %s209_s18 = scalar_lea.sflag [#allocation4], %s208_s13 }
  0x37   : > { %s266_s23 = scalar_lea.hbm %s1683_s3, %s849_s16  ;;  %s1725_s21 = smov 8  }
  0x38   : > { %s1726_s2 = smov 128   ;;  %s267_s1 = sshll.u32 %s266_s23, 4  ;;  %s268_s1 = int_to_ptr.hbm [resolvable:$true] %s267_s1 }
  0x39   : > { %894 = dma.hbm_to_vmem [thread:$0]  (!%p892_p11), %s219_s11, 512, %s221_s29, %s209_s18, %s1726_s2, %s1726_s2, %s1725_s21  }
  0x3a   : > { %s261_s25 = scalar_lea.vmem [#allocation8], %s1349_s12  ;;  %281 = sbr.rel (%p1373_p10) target bundleno = 476 (0x1dc), region = 40 }
  0x3b   : > { %s269_s4 = sshll.u32 %s261_s25, 4  ;;  %s1456_s20 = sand.u32 (!%p1373_p10), 1, %s1203_s22   ;;  %s270_s4 = int_to_ptr.vmem [resolvable:$true] %s269_s4 }
  0x3c   : > { %900 = dma.hbm_to_vmem [thread:$0]  (!%p1360_p7), %s268_s1, 2048, %s270_s4, %s1366_s8, %s1726_s2, %s1726_s2, %s1725_s21  }
  0x3d   : > { %s833_s27 = sshll.u32 (!%p1373_p10), %s1456_s20, 5  ;;  %s284_s23 = scalar_lea.sflag (!%p1373_p10), [#allocation4], %s1456_s20 }
  0x3e   : > { %s1460_s10 = scalar_lea.vmem (!%p1373_p10), [#allocation3], %s833_s27 }
  0x3f   : > { %1174 = dma.done.wait (%p1403_p8), %s284_s23, 512  }
  0x40   : > { %1176 = vsyncadd (%p1403_p8), %s284_s23, 4294966784  ;;  %s293_s2 = sand.u32 1, %s1378_s14   ;;  %s295_s21 = sand.u32 1, %s1191_s19  }
  0x41   : > { %s834_s12 = sshll.u32 %s295_s21, 7  ;;  %s294_s6 = scalar_lea.sflag [#allocation7], %s293_s2 }
  0x42   : > { %s1468_s8 = scalar_lea.vmem [#allocation6], %s834_s12 }
  0x43   : > { %1178 = dma.done.wait (%p1410_p1), %s294_s6, 4096  }
  0x44   : > { %1180 = vsyncadd (%p1410_p1), %s294_s6, 4294963200  ;;  %p349_p5 = scmp.lt.s32.totalorder %s1211_s24, 1  ;;  %s1727_s15 = sld [smem:[#allocation25_spill]] }
  0x45   : > { %s1482_s5 = scalar_lea.vmem [#allocation8], %s834_s12  ;;  %s1484_s30 = scalar_lea.vmem [#allocation9], %s833_s27 }
  0x46   : > { %s1476_s11 = scalar_select %p349_p5, %s1211_s24, 1 }
  0x47   : > { %p837_p7 = scmp.ne.s32.totalorder %s1211_s24, 0 }
  0x49   : > { %357 = sbr.rel (%p837_p7) target bundleno = 83 (0x53), region = 56 }
  0x4a   : > { %s351_s14 = scalar_lea.vmem %s1727_s15, %s1476_s11 }
  0x4e   : > { %v1232_v0 = vmov 0.0  }
  0x4f   : > { %358 = vst [vmem:[#allocation2 + $0x10] sm:$0xff] %v1232_v0 }
  0x50   : > { %359 = vst [vmem:[#allocation2] sm:$0xff] %v1232_v0 }
  0x51   : > { %360 = vst [vmem:[#allocation2 + $0x18] sm:$0xff] %v1232_v0 }
  0x52   : > { %361 = vst [vmem:[#allocation2 + $0x8] sm:$0xff] %v1232_v0 }
  0x53 PF: > { %v381_v1 = vld [vmem:[%s1468_s8 + $0x78] sm:$0xff]  ;;  %v380_v2 = vld [vmem:[%s1468_s8 + $0x70] sm:$0xff]  ;;  %v379_v3 = vld [vmem:[%s1468_s8 + $0x68] sm:$0xff]  ;;  %p842_p10 = scmp.ne.s32.totalorder %s1211_s24, 1 }
  0x54   : > { %386 = vmatpush.msra.mxu0 %v381_v1  ;;  %851 = vmatpush.msra.mxu2 %v381_v1  ;;  %v378_v4 = vld [vmem:[%s1468_s8 + $0x60] sm:$0xff]  ;;  %v377_v5 = vld [vmem:[%s1468_s8 + $0x58] sm:$0xff]  ;;  %v376_v6 = vld [vmem:[%s1468_s8 + $0x50] sm:$0xff]  ;;  %s1729_s1 = sld [smem:[#allocation26_spill]] (!%p842_p10) }
  0x55   : > { %v375_v7 = vld [vmem:[%s1468_s8 + $0x48] sm:$0xff]  ;;  %v374_v8 = vld [vmem:[%s1468_s8 + $0x40] sm:$0xff]  ;;  %v373_v9 = vld [vmem:[%s1468_s8 + $0x38] sm:$0xff] }
  0x56   : > { %387 = vmatpush.msra.mxu0 %v380_v2  ;;  %852 = vmatpush.msra.mxu2 %v380_v2  ;;  %v372_v10 = vld [vmem:[%s1468_s8 + $0x30] sm:$0xff]  ;;  %v371_v11 = vld [vmem:[%s1468_s8 + $0x28] sm:$0xff]  ;;  %v370_v12 = vld [vmem:[%s1468_s8 + $0x20] sm:$0xff] }
  0x57   : > { %v369_v13 = vld [vmem:[%s1468_s8 + $0x18] sm:$0xff]  ;;  %v368_v14 = vld [vmem:[%s1468_s8 + $0x10] sm:$0xff]  ;;  %v367_v15 = vld [vmem:[%s1468_s8 + $0x8] sm:$0xff] }
  0x58   : > { %388 = vmatpush.msra.mxu0 %v379_v3  ;;  %853 = vmatpush.msra.mxu2 %v379_v3  ;;  %v366_v16 = vld [vmem:[%s1468_s8] sm:$0xff]  ;;  %v364_v18 = vld [vmem:[%s1460_s10 + $0x10] sm:$0xff]  ;;  %v363_v19 = vld [vmem:[%s1460_s10 + $0x8] sm:$0xff] }
  0x59   : > { %v362_v17 = vld [vmem:[%s1460_s10] sm:$0xff]  ;;  %v365_v20 = vld [vmem:[%s1460_s10 + $0x18] sm:$0xff]  ;;  %v609_v22 = vld [vmem:[%s1482_s5 + $0x70] sm:$0xff] }
  0x5a   : > { %389 = vmatpush.msra.mxu0 %v378_v4  ;;  %854 = vmatpush.msra.mxu2 %v378_v4  ;;  %v610_v21 = vld [vmem:[%s1482_s5 + $0x78] sm:$0xff]  ;;  %v608_v23 = vld [vmem:[%s1482_s5 + $0x68] sm:$0xff]  ;;  %v1001_v24 = vld [vmem:[%s351_s14] ss:$0 sm:$0xff] }
  0x5b   : > { %611 = vmatpush.msra.mxu1 %v610_v21  ;;  %867 = vmatpush.msra.mxu3 %v610_v21  ;;  %v607_v25 = vld [vmem:[%s1482_s5 + $0x60] sm:$0xff]  ;;  %v606_v26 = vld [vmem:[%s1482_s5 + $0x58] sm:$0xff]  ;;  %v605_v29 = vld [vmem:[%s1482_s5 + $0x50] sm:$0xff] }
  0x5c   : > { %390 = vmatpush.msra.mxu0 %v377_v5  ;;  %855 = vmatpush.msra.mxu2 %v377_v5  ;;  %v604_v31 = vld [vmem:[%s1482_s5 + $0x48] sm:$0xff]  ;;  %v603_v33 = vld [vmem:[%s1482_s5 + $0x40] sm:$0xff]  ;;  %v602_v37 = vld [vmem:[%s1482_s5 + $0x38] sm:$0xff] }
  0x5d   : > { %612 = vmatpush.msra.mxu1 %v609_v22  ;;  %868 = vmatpush.msra.mxu3 %v609_v22  ;;  %v601_v42 = vld [vmem:[%s1482_s5 + $0x30] sm:$0xff]  ;;  %v600_v47 = vld [vmem:[%s1482_s5 + $0x28] sm:$0xff]  ;;  %v599_v48 = vld [vmem:[%s1482_s5 + $0x20] sm:$0xff] }
  0x5e   : > { %391 = vmatpush.msra.mxu0 %v376_v6  ;;  %856 = vmatpush.msra.mxu2 %v376_v6  ;;  %v598_v53 = vld [vmem:[%s1482_s5 + $0x18] sm:$0xff]  ;;  %v597_v60 = vld [vmem:[%s1482_s5 + $0x10] sm:$0xff]  ;;  %v596_v1 = vld [vmem:[%s1482_s5 + $0x8] sm:$0xff] }
  0x5f   : > { %613 = vmatpush.msra.mxu1 %v608_v23  ;;  %869 = vmatpush.msra.mxu3 %v608_v23 }
  0x60   : > { %392 = vmatpush.msra.mxu0 %v375_v7  ;;  %857 = vmatpush.msra.mxu2 %v375_v7 }
  0x61   : > { %614 = vmatpush.msra.mxu1 %v607_v25  ;;  %870 = vmatpush.msra.mxu3 %v607_v25 }
  0x62   : > { %393 = vmatpush.msra.mxu0 %v374_v8  ;;  %858 = vmatpush.msra.mxu2 %v374_v8 }
  0x63   : > { %615 = vmatpush.msra.mxu1 %v606_v26  ;;  %871 = vmatpush.msra.mxu3 %v606_v26 }
  0x64   : > { %394 = vmatpush.msra.mxu0 %v373_v9  ;;  %859 = vmatpush.msra.mxu2 %v373_v9  ;;  %v595_v9 = vld [vmem:[%s1482_s5] sm:$0xff] }
  0x65   : > { %616 = vmatpush.msra.mxu1 %v605_v29  ;;  %872 = vmatpush.msra.mxu3 %v605_v29 }
  0x66   : > { %395 = vmatpush.msra.mxu0 %v372_v10  ;;  %860 = vmatpush.msra.mxu2 %v372_v10 }
  0x67   : > { %617 = vmatpush.msra.mxu1 %v604_v31  ;;  %873 = vmatpush.msra.mxu3 %v604_v31 }
  0x68   : > { %396 = vmatpush.msra.mxu0 %v371_v11  ;;  %861 = vmatpush.msra.mxu2 %v371_v11 }
  0x69   : > { %618 = vmatpush.msra.mxu1 %v603_v33  ;;  %874 = vmatpush.msra.mxu3 %v603_v33 }
  0x6a   : > { %397 = vmatpush.msra.mxu0 %v370_v12  ;;  %862 = vmatpush.msra.mxu2 %v370_v12 }
  0x6b   : > { %619 = vmatpush.msra.mxu1 %v602_v37  ;;  %875 = vmatpush.msra.mxu3 %v602_v37 }
  0x6c   : > { %398 = vmatpush.msra.mxu0 %v369_v13  ;;  %863 = vmatpush.msra.mxu2 %v369_v13 }
  0x6d   : > { %620 = vmatpush.msra.mxu1 %v601_v42  ;;  %876 = vmatpush.msra.mxu3 %v601_v42 }
  0x6e   : > { %399 = vmatpush.msra.mxu0 %v368_v14  ;;  %864 = vmatpush.msra.mxu2 %v368_v14 }
  0x6f   : > { %621 = vmatpush.msra.mxu1 %v600_v47  ;;  %877 = vmatpush.msra.mxu3 %v600_v47 }
  0x70   : > { %400 = vmatpush.msra.mxu0 %v367_v15  ;;  %865 = vmatpush.msra.mxu2 %v367_v15 }
  0x71   : > { %622 = vmatpush.msra.mxu1 %v599_v48  ;;  %878 = vmatpush.msra.mxu3 %v599_v48 }
  0x72   : > { %401 = vmatpush.msra.mxu0 %v366_v16  ;;  %866 = vmatpush.msra.mxu2 %v366_v16 }
  0x73   : > { %402 = vmatmul.f32.vlgmr.msra.gmra.mxu0 %v362_v17  ;;  %408 = vmatmul.f32.vlgmr.msra.gmra.mxu2 %v364_v18 }
  0x74   : > { %623 = vmatpush.msra.mxu1 %v598_v53  ;;  %879 = vmatpush.msra.mxu3 %v598_v53 }
  0x76   : > { %624 = vmatpush.msra.mxu1 %v597_v60  ;;  %880 = vmatpush.msra.mxu3 %v597_v60 }
  0x78   : > { %625 = vmatpush.msra.mxu1 %v596_v1  ;;  %881 = vmatpush.msra.mxu3 %v596_v1 }
  0x7a   : > { %626 = vmatpush.msra.mxu1 %v595_v9  ;;  %882 = vmatpush.msra.mxu3 %v595_v9 }
  0x7b   : > { %405 = vmatmul.f32.gmra.mxu0 %v363_v19  ;;  %411 = vmatmul.f32.gmra.mxu2 %v365_v20 }
  0xf0   : > { %v403_v27 = vpop.f32.mrf.mxu0 }
  0xf1   : > { %v1517_v28 = vadd.f32 %v1001_v24, %v403_v27 }
  0xf3   : > { %v1521_v30 = vmul.f32 0.70710677, %v1517_v28 }
  0xf5   : > { %v423_v32 = vmul.f32 %v1521_v30, %v1521_v30 }
  0xf6   : > { %v409_v34 = vpop.f32.mrf.mxu2 }
  0xf7   : > { %v1527_v35 = vmin.f32 %v423_v32, 16.0  ;;  %v1529_v36 = vadd.f32 %v1001_v24, %v409_v34 }
  0xf8   : > { %v406_v38 = vpop.f32.mrf.mxu0 }
  0xf9   : > { %v425_v39 = vmul.f32 2.1237322e-06, %v1527_v35  ;;  %v1534_v40 = vmul.f32 0.70710677, %v1529_v36  ;;  %v1536_v41 = vadd.f32 %v1001_v24, %v406_v38  ;;  %v436_v43 = vmul.f32 3.8918573e-05, %v1527_v35 }
  0xfb   : > { %v426_v44 = vadd.f32 0.00028619796, %v425_v39  ;;  %v503_v45 = vmul.f32 %v1534_v40, %v1534_v40  ;;  %v1543_v46 = vmul.f32 0.70710677, %v1536_v41  ;;  %v437_v49 = vadd.f32 0.001143296, %v436_v43 }
  0xfd   : > { %v427_v50 = vmul.f32 %v426_v44, %v1527_v35  ;;  %v1548_v51 = vmin.f32 %v503_v45, 16.0  ;;  %v463_v52 = vmul.f32 %v1543_v46, %v1543_v46  ;;  %v438_v55 = vmul.f32 %v437_v49, %v1527_v35 }
  0xfe   : > { %v412_v54 = vpop.f32.mrf.mxu2 }
  0xff   : > { %v428_v56 = vadd.f32 0.0036580483, %v427_v50  ;;  %v505_v57 = vmul.f32 2.1237322e-06, %v1548_v51  ;;  %v1555_v58 = vmin.f32 %v463_v52, 16.0  ;;  %v1557_v59 = vadd.f32 %v1001_v24, %v412_v54 }
 0x100   : > { %v439_v61 = vadd.f32 0.014752088, %v438_v55  ;;  %v516_v62 = vmul.f32 3.8918573e-05, %v1548_v51 }
 0x101   : > { %v506_v63 = vadd.f32 0.00028619796, %v505_v57  ;;  %v465_v0 = vmul.f32 2.1237322e-06, %v1555_v58  ;;  %v1564_v2 = vmul.f32 0.70710677, %v1557_v59  ;;  %v429_v6 = vmul.f32 %v428_v56, %v1527_v35 }
 0x102   : > { %v440_v3 = vmul.f32 %v439_v61, %v1527_v35  ;;  %v517_v4 = vadd.f32 0.001143296, %v516_v62  ;;  %v476_v5 = vmul.f32 3.8918573e-05, %v1555_v58 }
 0x103   : > { %v507_v7 = vmul.f32 %v506_v63, %v1548_v51  ;;  %v466_v8 = vadd.f32 0.00028619796, %v465_v0  ;;  %v543_v10 = vmul.f32 %v1564_v2, %v1564_v2  ;;  %v430_v20 = vadd.f32 0.05243302, %v429_v6 }
 0x104   : > { %v441_v11 = vadd.f32 0.112945676, %v440_v3  ;;  %v518_v12 = vmul.f32 %v517_v4, %v1548_v51  ;;  %v477_v13 = vadd.f32 0.001143296, %v476_v5 }
 0x105   : > { %v508_v14 = vadd.f32 0.0036580483, %v507_v7  ;;  %v467_v15 = vmul.f32 %v466_v8, %v1555_v58  ;;  %v1575_v16 = vmin.f32 %v543_v10, 16.0  ;;  %v431_v34 = vmul.f32 %v430_v20, %v1527_v35 }
 0x106   : > { %v442_v17 = vmul.f32 %v441_v11, %v1527_v35  ;;  %v519_v18 = vadd.f32 0.014752088, %v518_v12  ;;  %v478_v19 = vmul.f32 %v477_v13, %v1555_v58 }
 0x107   : > { %v509_v21 = vmul.f32 %v508_v14, %v1548_v51  ;;  %v545_v22 = vmul.f32 2.1237322e-06, %v1575_v16  ;;  %v468_v26 = vadd.f32 0.0036580483, %v467_v15  ;;  %v556_v27 = vmul.f32 3.8918573e-05, %v1575_v16 }
 0x108   : > { %v443_v23 = vadd.f32 0.4994258, %v442_v17  ;;  %v520_v24 = vmul.f32 %v519_v18, %v1548_v51  ;;  %v479_v25 = vadd.f32 0.014752088, %v478_v19  ;;  %v432_v49 = vadd.f32 0.18741608, %v431_v34 }
 0x109   : > { %v546_v29 = vadd.f32 0.00028619796, %v545_v22  ;;  %v557_v37 = vadd.f32 0.001143296, %v556_v27  ;;  %v510_v38 = vadd.f32 0.05243302, %v509_v21  ;;  %v469_v44 = vmul.f32 %v468_v26, %v1555_v58 }
 0x10a   : > { %v444_v31 = vmul.f32 %v443_v23, %v1527_v35  ;;  %v521_v32 = vadd.f32 0.112945676, %v520_v24  ;;  %v480_v33 = vmul.f32 %v479_v25, %v1555_v58  ;;  %v433_v63 = vmul.f32 %v432_v49, %v1527_v35 }
 0x10b   : > { %v558_v45 = vmul.f32 %v557_v37, %v1575_v16  ;;  %v547_v47 = vmul.f32 %v546_v29, %v1575_v16  ;;  %v511_v50 = vmul.f32 %v510_v38, %v1548_v51  ;;  %v470_v54 = vadd.f32 0.05243302, %v469_v44 }
 0x10c   : > { %v445_v39 = vadd.f32 1.0, %v444_v31  ;;  %v522_v42 = vmul.f32 %v521_v32, %v1548_v51  ;;  %v481_v43 = vadd.f32 0.112945676, %v480_v33  ;;  %v434_v10 = vadd.f32 1.1283791, %v433_v63 }
 0x10d   : > { %v559_v53 = vadd.f32 0.014752088, %v558_v45  ;;  %v548_v56 = vadd.f32 0.0036580483, %v547_v47  ;;  %v512_v0 = vadd.f32 0.18741608, %v511_v50  ;;  %v471_v4 = vmul.f32 %v470_v54, %v1555_v58 }
 0x10e   : > { %1002 = vrcp.f32 %v445_v39  ;;  %v523_v48 = vadd.f32 0.4994258, %v522_v42  ;;  %v482_v52 = vmul.f32 %v481_v43, %v1555_v58  ;;  %v455_v12 = vand.u32 2147483647, %v445_v39 }
 0x10f   : > { %v560_v60 = vmul.f32 %v559_v53, %v1575_v16  ;;  %v549_v6 = vmul.f32 %v548_v56, %v1575_v16  ;;  %v513_v11 = vmul.f32 %v512_v0, %v1548_v51  ;;  %v457_v35 = vand.u32 2147483648, %v445_v39 }
 0x110   : > { %v524_v55 = vmul.f32 %v523_v48, %v1548_v51  ;;  %v483_v57 = vadd.f32 0.4994258, %v482_v52  ;;  %v472_v13 = vadd.f32 0.18741608, %v471_v4  ;;  %vm451_vm1 = vweird.f32 %v445_v39 }
 0x111   : > { %v561_v3 = vadd.f32 0.112945676, %v560_v60  ;;  %v550_v15 = vadd.f32 0.05243302, %v549_v6  ;;  %v435_v20 = vmul.f32 %v434_v10, %v1521_v30  ;;  %vm456_vm3 = vcmp.eq.f32.partialorder %v455_v12, 8.507059e+37 }
 0x112   : > { %v525_v61 = vadd.f32 1.0, %v524_v55  ;;  %v484_v1 = vmul.f32 %v483_v57, %v1555_v58  ;;  %v458_v21 = vor.u32 1.1754944e-38, %v457_v35  ;;  %v514_v23 = vadd.f32 1.1283791, %v513_v11 }
 0x113   : > { %v562_v9 = vmul.f32 %v561_v3, %v1575_v16  ;;  %v473_v51 = vmul.f32 %v472_v13, %v1555_v58  ;;  %v551_v26 = vmul.f32 %v550_v15, %v1575_v16  ;;  %v415_v30 = vmul.f32 0.5, %v1517_v28 }
 0x114   : > { %v1003_v62 = vpop.eup %1002  ;;  %1004 = vrcp.f32 %v525_v61  ;;  %v1598_v8 = vadd.f32 1.0, %v484_v1  ;;  %v535_v33 = vand.u32 2147483647, %v525_v61  ;;  %v537_v34 = vand.u32 2147483648, %v525_v61 }
 0x115   : > { %v447_v5 = vmul.f32 %v1003_v62, %v445_v39  ;;  %vm452_vm0 = vweird.f32 %v1003_v62  ;;  %v563_v17 = vadd.f32 0.4994258, %v562_v9  ;;  %v515_v58 = vmul.f32 %v514_v23, %v1534_v40 }
 0x116   : > { %1006 = vrcp.f32 %v1598_v8  ;;  %vm453_vm2 = vmor %vm451_vm1, %vm452_vm0  ;;  %v474_v42 = vadd.f32 1.1283791, %v473_v51  ;;  %v552_v44 = vadd.f32 0.18741608, %v551_v26  ;;  %vm531_vm5 = vweird.f32 %v525_v61 }
 0x117   : > { %v448_v7 = vsub.f32 1.0, %v447_v5  ;;  %v564_v25 = vmul.f32 %v563_v17, %v1575_v16  ;;  %vm536_vm7 = vcmp.eq.f32.partialorder %v535_v33, 8.507059e+37  ;;  %v538_v49 = vor.u32 1.1754944e-38, %v537_v34 }
 0x118   : > { %v497_v50 = vand.u32 2147483648, %v1598_v8  ;;  %v495_v53 = vand.u32 2147483647, %v1598_v8  ;;  %vm491_vm9 = vweird.f32 %v1598_v8  ;;  %v475_v60 = vmul.f32 %v474_v42, %v1543_v46 }
 0x119   : > { %v449_v14 = vmul.f32 %v1003_v62, %v448_v7  ;;  %v565_v37 = vadd.f32 1.0, %v564_v25  ;;  %v417_v4 = vmul.f32 0.5, %v1529_v36  ;;  %v592_v25 = vld [vmem:[#allocation2] sm:$0xff] }
 0x11a   : > { %v1005_v18 = vpop.eup %1004  ;;  %vm496_vm11 = vcmp.eq.f32.partialorder %v495_v53, 8.507059e+37 }
 0x11b   : > { %v450_v19 = vadd.f32 %v1003_v62, %v449_v14  ;;  %v527_v22 = vmul.f32 %v1005_v18, %v525_v61  ;;  %vm532_vm4 = vweird.f32 %v1005_v18  ;;  %1008 = vrcp.f32 %v565_v37 }
 0x11c   : > { %v1007_v31 = vpop.eup %1006  ;;  %vm533_vm6 = vmor %vm531_vm5, %vm532_vm4  ;;  %v553_v61 = vmul.f32 %v552_v44, %v1575_v16  ;;  %v577_v10 = vand.u32 2147483648, %v565_v37  ;;  %v416_v16 = vmul.f32 0.5, %v1536_v41  ;;  %vm571_vm13 = vweird.f32 %v565_v37  ;;  %v591_v41 = vld [vmem:[#allocation2 + $0x10] sm:$0xff] }
 0x11d   : > { %v454_v24 = vsel %vm453_vm2, %v1003_v62, %v450_v19  ;;  %v528_v29 = vsub.f32 1.0, %v527_v22  ;;  %v487_v39 = vmul.f32 %v1007_v31, %v1598_v8  ;;  %vm492_vm8 = vweird.f32 %v1007_v31 }
 0x11e   : > { %v459_v27 = vsel %vm456_vm3, %v458_v21, %v454_v24  ;;  %vm493_vm10 = vmor %vm491_vm9, %vm492_vm8  ;;  %v498_v62 = vor.u32 1.1754944e-38, %v497_v50  ;;  %v554_v9 = vadd.f32 1.1283791, %v553_v61  ;;  %v575_v8 = vand.u32 2147483647, %v565_v37 }
 0x11f   : > { %v460_v32 = vmul.f32 %v459_v27, %v435_v20  ;;  %v529_v38 = vmul.f32 %v1005_v18, %v528_v29  ;;  %v488_v47 = vsub.f32 1.0, %v487_v39  ;;  %v578_v14 = vor.u32 1.1754944e-38, %v577_v10  ;;  %v593_v27 = vld [vmem:[#allocation2 + $0x18] sm:$0xff] }
 0x120   : > { %v555_v36 = vmul.f32 %v554_v9, %v1564_v2  ;;  %vm576_vm15 = vcmp.eq.f32.partialorder %v575_v8, 8.507059e+37  ;;  %v418_v21 = vmul.f32 0.5, %v1557_v59 }
 0x121   : > { %v838_v43 = vclamps-f32 %v460_v32, 1.0  ;;  %v530_v45 = vadd.f32 %v1005_v18, %v529_v38  ;;  %v489_v52 = vmul.f32 %v1007_v31, %v488_v47  ;;  %v1009_v57 = vpop.eup %1008  ;;  %v594_v32 = vld [vmem:[#allocation2 + $0x8] sm:$0xff] }
 0x122   : > { %v567_v1 = vmul.f32 %v1009_v57, %v565_v37  ;;  %vm572_vm12 = vweird.f32 %v1009_v57 }
 0x123   : > { %v583_v48 = vadd.f32 1.0, %v838_v43  ;;  %v534_v28 = vsel %vm533_vm6, %v1005_v18, %v530_v45  ;;  %v490_v56 = vadd.f32 %v1007_v31, %v489_v52  ;;  %vm573_vm14 = vmor %vm571_vm13, %vm572_vm12 }
 0x124   : > { %v539_v40 = vsel %vm536_vm7, %v538_v49, %v534_v28  ;;  %v568_v7 = vsub.f32 1.0, %v567_v1 }
 0x125   : > { %v587_v54 = vmul.f32 %v583_v48, %v415_v30  ;;  %v540_v55 = vmul.f32 %v539_v40, %v515_v58  ;;  %v494_v0 = vsel %vm493_vm10, %v1007_v31, %v490_v56 }
 0x126   : > { %v499_v3 = vsel %vm496_vm11, %v498_v62, %v494_v0  ;;  %v569_v12 = vmul.f32 %v1009_v57, %v568_v7 }
 0x127   : > { %627 = vmatmul.f32.vlgmr.msra.gmra.mxu1 %v587_v54  ;;  %v840_v63 = vclamps-f32 %v540_v55, 1.0  ;;  %v500_v6 = vmul.f32 %v499_v3, %v475_v60 }
 0x128   : > { %v570_v13 = vadd.f32 %v1009_v57, %v569_v12 }
 0x129   : > { %v585_v5 = vadd.f32 1.0, %v840_v63  ;;  %v839_v46 = vclamps-f32 %v500_v6, 1.0 }
 0x12a   : > { %v574_v17 = vsel %vm573_vm14, %v1009_v57, %v570_v13 }
 0x12b   : > { %v589_v11 = vmul.f32 %v585_v5, %v417_v4  ;;  %v584_v35 = vadd.f32 1.0, %v839_v46  ;;  %v579_v18 = vsel %vm576_vm15, %v578_v14, %v574_v17 }
 0x12c   : > { %v580_v19 = vmul.f32 %v579_v18, %v555_v36 }
 0x12d   : > { %633 = vmatmul.f32.vlgmr.msra.gmra.mxu3 %v589_v11  ;;  %v588_v15 = vmul.f32 %v584_v35, %v416_v16 }
 0x12e   : > { %v841_v20 = vclamps-f32 %v580_v19, 1.0 }
 0x12f   : > { %630 = vmatmul.f32.gmra.mxu1 %v588_v15 }
 0x130   : > { %v586_v22 = vadd.f32 1.0, %v841_v20 }
 0x132   : > { %v590_v23 = vmul.f32 %v586_v22, %v418_v21 }
 0x135   : > { %636 = vmatmul.f32.gmra.mxu3 %v590_v23 }
 0x1a4   : > { %v628_v51 = vpop.f32.mrf.mxu1 }
 0x1a5   : > { %v640_v24 = vadd.f32 %v628_v51, %v591_v41 }
 0x1a7   : > { %644 = vst [vmem:[#allocation2 + $0x10] sm:$0xff] %v640_v24 }
 0x1ac   : > { %v631_v26 = vpop.f32.mrf.mxu1 }
 0x1ad   : > { %v641_v2 = vadd.f32 %v631_v26, %v592_v25 }
 0x1af   : > { %645 = vst [vmem:[#allocation2] sm:$0xff] %v641_v2 }
 0x1b0   : > { %v634_v29 = vpop.f32.mrf.mxu3 }
 0x1b1   : > { %v642_v31 = vadd.f32 %v634_v29, %v593_v27 }
 0x1b3   : > { %646 = vst [vmem:[#allocation2 + $0x18] sm:$0xff] %v642_v31 }
 0x1b7   : > { %651 = sbr.rel (%p842_p10) target bundleno = 454 (0x1c6), region = 60 }
 0x1b8   : > { %v637_v33 = vpop.f32.mrf.mxu3 }
 0x1b9   : > { %v643_v34 = vadd.f32 %v637_v33, %v594_v32 }
 0x1bb   : > { %647 = vst [vmem:[#allocation2 + $0x8] sm:$0xff] %v643_v34 }
 0x1bc   : > { %v652_v59 = vld [vmem:[#allocation2 + $0x10] sm:$0xff]  ;;  %v1010_v37 = vld [vmem:[%s1729_s1] ss:$0 sm:$0xff]  ;;  %v654_v38 = vld [vmem:[#allocation2 + $0x18] sm:$0xff] }
 0x1bd   : > { %v653_v30 = vld [vmem:[#allocation2] sm:$0xff]  ;;  %v660_v58 = vadd.f32 %v1010_v37, %v652_v59  ;;  %v662_v43 = vadd.f32 %v1010_v37, %v654_v38 }
 0x1be   : > { %v661_v42 = vadd.f32 %v1010_v37, %v653_v30 }
 0x1bf   : > { %664 = vst [vmem:[%s1484_s30] sm:$0xff] %v660_v58 }
 0x1c0   : > { %665 = vst [vmem:[%s1484_s30 + $0x8] sm:$0xff] %v661_v42 }
 0x1c1   : > { %666 = vst [vmem:[%s1484_s30 + $0x10] sm:$0xff] %v662_v43 }
 0x1c2   : > { %v655_v39 = vld [vmem:[#allocation2 + $0x8] sm:$0xff] }
 0x1c3   : > { %v663_v44 = vadd.f32 %v1010_v37, %v655_v39 }
 0x1c5   : > { %667 = vst [vmem:[%s1484_s30 + $0x18] sm:$0xff] %v663_v44 }
 0x1c6 PF: > { %s1730_s24 = sld [smem:[#allocation16_spill]]  ;;  %s681_s21 = sshll.u32 %s1484_s30, 4  ;;  %s682_s21 = int_to_ptr.vmem [resolvable:$true] %s681_s21 }
 0x1c7   : > { %s1732_s10 = sld [smem:[#allocation27_spill]]  ;;  %s669_s6 = scalar_lea.sflag [#allocation5], %s1456_s20 }
 0x1cc   : > { %s850_s4 = sshll.u32 %s1730_s24, 5 }
 0x1cd   : > { %s680_s2 = scalar_lea.hbm %s1732_s10, %s850_s4  ;;  %s1121_s15 = scalar_lea.hbm %s1732_s10, 64 }
 0x1ce   : > { %s683_s12 = sshll.u32 %s680_s2, 4  ;;  %s684_s12 = int_to_ptr.hbm [resolvable:$true] %s683_s12 }
 0x1cf   : > { %s1115_s8 = sshra.s32 %s684_s12, 4  ;;  %s1116_s8 = int_to_ptr.hbm [resolvable:$true] %s1115_s8 }
 0x1d0   : > { %s1117_s11 = scalar_lea.hbm %s1116_s8, 32  ;;  %p1122_p6 = scmp.lt.s32.totalorder %s1116_s8, %s1732_s10 }
 0x1d1   : > { %p1118_p12 = scmp.ne.s32.totalorder %s1116_s8, %s1117_s11  ;;  %p1123_p8 = scmp.lt.s32.totalorder %s1121_s15, %s1117_s11 }
 0x1d3   : > { %p1119_p2 = pnand %p1118_p12, %p1416_p0  ;;  %p1124_p1 = por %p1123_p8, %p1122_p6 }
 0x1d5   : > { %p1120_p4 = pneg %p1119_p2 }
 0x1d7   : > { %p1125_p9 = pnand %p1124_p1, %p1120_p4 }
 0x1d9   : > { %1128 = shalt.err (!%p1125_p9)
}
 0x1da   : > { %s1233_s20 = smov 128   ;;  %s1234_s30 = smov 8  }
 0x1db   : > { %889 = dma.vmem_to_hbm [thread:$0]  (%p1416_p0), %s682_s21, 512, %s684_s12, %s669_s6, %s1233_s20, %s1233_s20, %s1234_s30  }
 0x1dc PF: > { %s1733_s17 = sld [smem:[#allocation14_spill]]  ;;  %p906_p13 = scmp.ge.s32.totalorder %s1227_s28, 2 }
 0x1de   : > { %p902_p11 = pnand %p906_p13, %p1428_p3 }
 0x1e0   : > { %p903_p5 = pneg %p902_p11 }
 0x1e2   : > { %s698_s9 = sand.u32 1, %s1733_s17  }
 0x1e3   : > { %s699_s29 = scalar_lea.sflag [#allocation5], %s698_s9 }
 0x1e4   : > { %1182 = dma.done.wait (%p903_p5), %s699_s29, 512  }
 0x1e5   : > { %1184 = vsyncadd (%p903_p5), %s699_s29, 4294966784  ;;  %s24_s28 = sadd.s32 1, %s1227_s28   ;;  %s1735_s16 = sld [smem:[#allocation13_spill]] }
 0x1e6   : > { %p21_p7 = scmp.ge.s32.totalorder %s24_s28, 6   ;;  %s1736_s20 = sld [smem:[#allocation19_spill]] }
 0x1e7   : > { %s1737_s1 = sld [smem:[#allocation15_spill]]  ;;  %s1742_s18 = smov %s1191_s19 }
 0x1e8   : > { %s1738_s23 = sld [smem:[#allocation22_spill]]  ;;  %s1744_s21 = smov %s1203_s22 }
 0x1e9   : > { %s1739_s25 = sld [smem:[#allocation17_spill]]  ;;  %s1746_s24 = smov %s1219_s26 }
 0x1ea   : > { %s1740_s4 = sld [smem:[#allocation18_spill]] }
 0x1eb   : > { %s1741_s27 = sld [smem:[#allocation20_spill]]  ;;  %s1743_s19 = smov %s1735_s16 }
 0x1ec   :  { %23 = sbr.rel (!%p21_p7) target bundleno = 16 (0x10), region = 120 }
 0x1ed   : > { %s1745_s22 = smov %s1737_s1 }
 0x1f0   : > { %s1747_s26 = smov %s1740_s4 }
 0x1f1   :  { %705 = vsyncpa [#allocation4], 1 }
 0x1f2   :  { %707 = vsyncpa [#allocation4 + $0x1], 1 }
 0x1f3   :  { %708 = vsyncpa [#allocation7], 1 }
 0x1f4   :  { %710 = vsyncpa [#allocation7 + $0x1], 1 }
 0x1f5   :  { %711 = vsyncpa [#allocation5], 1 }
 0x1f6   :  { %713 = vsyncpa [#allocation5 + $0x1], 1 }

</bundles_post_ra>
